<compile_context>
chip_gen: v7x
topology: tpu7x:2x2x1
jax: 0.10.0
libtpu: 0.0.40
codegen_flags: <defaults>
</compile_context>

<pallas_src>
import functools

import jax
import jax.numpy as jnp
from jax import lax
from jax.experimental import pallas as pl
from jax.experimental.pallas import tpu as pltpu

JOIN_SIZE = 128            # join_size is undefined in the reference module; lane-aligned choice
HIDDEN = 256
DEFAULT_BATCH_TILE = 512   # sweep 256/512/1024; f32/bf16 tiles stay far under scoped VMEM


def _round_up(x, m):
    return (x + m - 1) // m * m


def _mlp_kernel(x_ref, w1_ref, b1_ref, w2_ref, b2_ref, w3_ref, b3_ref, o_ref):
    """One fused pass over a batch tile of M rows.

    Feature-major dataflow:
        h1 = w1 @ x^T  : (H, M)
        h2 = w2 @ h1   : (H, M)
        z  = w3 @ h2   : (1, M)   <- lane-dense output row
    bf16 operands on the MXU, f32 accumulation / bias / relu / sigmoid.
    """
    # fc1 as a transposed-RHS matmul (contract both operands on their dim 1):
    # (H, J) x (M, J)^T -> (H, M).  Avoids an explicit XLU transpose of x.
    h1 = lax.dot_general(
        w1_ref[...], x_ref[...],
        dimension_numbers=(((1,), (1,)), ((), ())),
        preferred_element_type=jnp.float32,
    )
    h1 = jnp.maximum(h1 + b1_ref[...], 0.0)          # + (H,1) bias, ReLU in f32

    # fc2: (H, H) @ (H, M) -> (H, M)
    h2 = jnp.dot(w2_ref[...], h1.astype(jnp.bfloat16),
                 preferred_element_type=jnp.float32)
    h2 = jnp.maximum(h2 + b2_ref[...], 0.0)

    # fc3: (1, H) @ (H, M) -> (1, M): the full M lanes of the pass are useful,
    # and the result is already lane-dense for the store.
    z = jnp.dot(w3_ref[...], h2.astype(jnp.bfloat16),
                preferred_element_type=jnp.float32)
    z = z + b3_ref[...]                               # (1,1) broadcast

    # sigmoid(z) = 1 / (1 + exp(-z)) in f32 (exp on the EUP)
    o_ref[...] = (1.0 / (1.0 + jnp.exp(-z))).astype(o_ref.dtype)


@functools.partial(jax.jit, static_argnames=("batch_tile",))
def relation_model_forward(x, w1, b1, w2, b2, w3, b3, *, batch_tile=DEFAULT_BATCH_TILE):
    """x: (B, join_size) f32 -> (B, 1) f32 probabilities."""
    B, J = x.shape
    H = w1.shape[0]

    # Large, lane-aligned batch tile (amortizes ~0.35us/step pipeline overhead
    # and keeps the MXU streaming hundreds of rows per pass), clamped to the
    # padded batch.  Ragged batches are zero-padded and sliced afterwards.
    bt = min(batch_tile, _round_up(B, 128))
    Bp = _round_up(B, bt)
    grid = (Bp // bt,)

    # bf16 MXU operands; biases stay f32.
    xb = x.astype(jnp.bfloat16)
    if Bp != B:
        xb = jnp.pad(xb, ((0, Bp - B), (0, 0)))
    w1b = w1.astype(jnp.bfloat16)
    w2b = w2.astype(jnp.bfloat16)
    w3b = w3.astype(jnp.bfloat16)

    cost = pl.CostEstimate(
        flops=2 * Bp * (J * H + H * H + H),
        transcendentals=Bp,
        bytes_accessed=(xb.size * 2
                        + (w1b.size + w2b.size + w3b.size) * 2
                        + (b1.size + b2.size + b3.size) * 4
                        + Bp * 4),
    )

    out = pl.pallas_call(
        _mlp_kernel,
        out_shape=jax.ShapeDtypeStruct((1, Bp), jnp.float32),   # lane-dense slab
        grid_spec=pltpu.PrefetchScalarGridSpec(
            num_scalar_prefetch=0,
            grid=grid,
            in_specs=[
                pl.BlockSpec((bt, J), lambda i: (i, 0)),        # x tile
                pl.BlockSpec((H, J), lambda i: (0, 0)),         # w1 (out, in)
                pl.BlockSpec((H, 1), lambda i: (0, 0)),         # b1 column
                pl.BlockSpec((H, H), lambda i: (0, 0)),         # w2
                pl.BlockSpec((H, 1), lambda i: (0, 0)),         # b2
                pl.BlockSpec((1, H), lambda i: (0, 0)),         # w3 row
                pl.BlockSpec((1, 1), lambda i: (0, 0)),         # b3
            ],
            out_specs=pl.BlockSpec((1, bt), lambda i: (0, i)),  # lane-dense row per tile
        ),
        compiler_params=pltpu.CompilerParams(
            dimension_semantics=("parallel",),   # shards grid steps across v7x's 2 TCs
        ),
        cost_estimate=cost,
    )(xb, w1b, b1, w2b, b2, w3b, b3)

    return out.reshape(Bp, 1)[:B]


def init_params(key, join_size=JOIN_SIZE, hidden=HIDDEN):
    """nn.Linear-style init, PyTorch-native (out, in) weight layout, (out, 1) biases."""
    ks = jax.random.split(key, 6)

    def lin(kw, kb, fan_in, fan_out):
        bound = 1.0 / jnp.sqrt(fan_in)
        w = jax.random.uniform(kw, (fan_out, fan_in), jnp.float32, -bound, bound)
        b = jax.random.uniform(kb, (fan_out, 1), jnp.float32, -bound, bound)
        return w, b

    w1, b1 = lin(ks[0], ks[1], join_size, hidden)
    w2, b2 = lin(ks[2], ks[3], hidden, hidden)
    w3, b3 = lin(ks[4], ks[5], hidden, 1)
    return w1, b1, w2, b2, w3, b3


def reference_forward(x, w1, b1, w2, b2, w3, b3):
    """Pure-JAX reference mirroring the kernel's bf16-operand / f32-accum casts."""
    bf = lambda a: a.astype(jnp.bfloat16).astype(jnp.float32)
    h1 = jnp.maximum(bf(x) @ bf(w1).T + b1.T, 0.0)
    h2 = jnp.maximum(bf(h1) @ bf(w2).T + b2.T, 0.0)
    return jax.nn.sigmoid(bf(h2) @ bf(w3).T + b3.T)


if __name__ == "__main__":
    key = jax.random.PRNGKey(0)
    k_x, k_p = jax.random.split(key)

    # Small demo shapes: ragged batch (exercises padding) + batch_tile=128 so the
    # grid has 2 steps. Production default is batch_tile=512.
    B = 200
    x = jax.random.normal(k_x, (B, JOIN_SIZE), jnp.float32)
    params = init_params(k_p)

    out = jax.block_until_ready(relation_model_forward(x, *params, batch_tile=128))
    ref = reference_forward(x, *params)

    assert out.shape == (B, 1)
    assert jnp.max(jnp.abs(out - ref)) < 2e-2, "mismatch vs reference"

    print("KERNEL_OK")
</pallas_src>

<mosaic_0001>
module attributes {stable_mosaic.version = 11 : i64} {
  func.func @_mlp_kernel(%arg0: i32, %arg1: memref<128x128xbf16, #tpu.memory_space<vmem>>, %arg2: memref<256x128xbf16, #tpu.memory_space<vmem>>, %arg3: memref<256x1xf32, #tpu.memory_space<vmem>>, %arg4: memref<256x256xbf16, #tpu.memory_space<vmem>>, %arg5: memref<256x1xf32, #tpu.memory_space<vmem>>, %arg6: memref<1x256xbf16, #tpu.memory_space<vmem>>, %arg7: memref<1x1xf32, #tpu.memory_space<vmem>>, %arg8: memref<1x128xf32, #tpu.memory_space<vmem>>) attributes {dimension_semantics = [#tpu.dimension_semantics<parallel>], iteration_bounds = array<i64: 2>, scalar_prefetch = 0 : i64, scratch_operands = 0 : i64, tpu.core_type = #tpu.core_type<tc>, window_params = [{transform_indices = @transform_0, window_bounds = array<i64: 128, 128>}, {pipeline_mode = #tpu.pipeline_mode<synchronous>, transform_indices = @transform_1, window_bounds = array<i64: 256, 128>}, {pipeline_mode = #tpu.pipeline_mode<synchronous>, transform_indices = @transform_2, window_bounds = array<i64: 256, 1>}, {pipeline_mode = #tpu.pipeline_mode<synchronous>, transform_indices = @transform_3, window_bounds = array<i64: 256, 256>}, {pipeline_mode = #tpu.pipeline_mode<synchronous>, transform_indices = @transform_4, window_bounds = array<i64: 256, 1>}, {pipeline_mode = #tpu.pipeline_mode<synchronous>, transform_indices = @transform_5, window_bounds = array<i64: 1, 256>}, {pipeline_mode = #tpu.pipeline_mode<synchronous>, transform_indices = @transform_6, window_bounds = array<i64: 1, 1>}, {transform_indices = @transform_7, window_bounds = array<i64: 1, 128>}]} {
    %c0 = arith.constant 0 : index
    %c0_0 = arith.constant 0 : index
    %0 = vector.load %arg2[%c0, %c0_0] : memref<256x128xbf16, #tpu.memory_space<vmem>>, vector<256x128xbf16>
    %c0_1 = arith.constant 0 : index
    %c0_2 = arith.constant 0 : index
    %1 = vector.load %arg1[%c0_1, %c0_2] : memref<128x128xbf16, #tpu.memory_space<vmem>>, vector<128x128xbf16>
    %cst = arith.constant dense<0.000000e+00> : vector<256x128xf32>
    %2 = tpu.matmul %0, %1, %cst {dimension_numbers = #tpu.dot_dimension_numbers<[1], [1], [0], [0], [0, 0, 1, 0], [], []>} : vector<256x128xbf16>, vector<128x128xbf16>, vector<256x128xf32> -> vector<256x128xf32>
    %c0_3 = arith.constant 0 : index
    %c0_4 = arith.constant 0 : index
    %3 = vector.load %arg3[%c0_3, %c0_4] : memref<256x1xf32, #tpu.memory_space<vmem>>, vector<256x1xf32>
    %4 = vector.broadcast %3 : vector<256x1xf32> to vector<256x128xf32>
    %5 = arith.addf %2, %4 : vector<256x128xf32>
    %cst_5 = arith.constant 0.000000e+00 : f32
    %6 = vector.broadcast %cst_5 : f32 to vector<256x128xf32>
    %7 = arith.maximumf %5, %6 : vector<256x128xf32>
    %c0_6 = arith.constant 0 : index
    %c0_7 = arith.constant 0 : index
    %8 = vector.load %arg4[%c0_6, %c0_7] : memref<256x256xbf16, #tpu.memory_space<vmem>>, vector<256x256xbf16>
    %9 = arith.truncf %7 : vector<256x128xf32> to vector<256x128xbf16>
    %cst_8 = arith.constant dense<0.000000e+00> : vector<256x128xf32>
    %10 = tpu.matmul %8, %9, %cst_8 {dimension_numbers = #tpu.dot_dimension_numbers<[1], [0], [0], [1], [0, 0, 1, 1], [], []>} : vector<256x256xbf16>, vector<256x128xbf16>, vector<256x128xf32> -> vector<256x128xf32>
    %c0_9 = arith.constant 0 : index
    %c0_10 = arith.constant 0 : index
    %11 = vector.load %arg5[%c0_9, %c0_10] : memref<256x1xf32, #tpu.memory_space<vmem>>, vector<256x1xf32>
    %12 = vector.broadcast %11 : vector<256x1xf32> to vector<256x128xf32>
    %13 = arith.addf %10, %12 : vector<256x128xf32>
    %cst_11 = arith.constant 0.000000e+00 : f32
    %14 = vector.broadcast %cst_11 : f32 to vector<256x128xf32>
    %15 = arith.maximumf %13, %14 : vector<256x128xf32>
    %c0_12 = arith.constant 0 : index
    %c0_13 = arith.constant 0 : index
    %16 = vector.load %arg6[%c0_12, %c0_13] : memref<1x256xbf16, #tpu.memory_space<vmem>>, vector<1x256xbf16>
    %17 = arith.truncf %15 : vector<256x128xf32> to vector<256x128xbf16>
    %cst_14 = arith.constant dense<0.000000e+00> : vector<1x128xf32>
    %18 = tpu.matmul %16, %17, %cst_14 {dimension_numbers = #tpu.dot_dimension_numbers<[1], [0], [0], [1], [0, 0, 1, 1], [], []>} : vector<1x256xbf16>, vector<256x128xbf16>, vector<1x128xf32> -> vector<1x128xf32>
    %c0_15 = arith.constant 0 : index
    %c0_16 = arith.constant 0 : index
    %19 = vector.load %arg7[%c0_15, %c0_16] : memref<1x1xf32, #tpu.memory_space<vmem>>, vector<1x1xf32>
    %20 = vector.broadcast %19 : vector<1x1xf32> to vector<1x128xf32>
    %21 = arith.addf %18, %20 : vector<1x128xf32>
    %cst_17 = arith.constant 0.000000e+00 : f32
    %22 = vector.broadcast %cst_17 : f32 to vector<1x128xf32>
    %23 = arith.subf %22, %21 : vector<1x128xf32>
    %24 = math.exp %23 : vector<1x128xf32>
    %cst_18 = arith.constant 1.000000e+00 : f32
    %25 = vector.broadcast %cst_18 : f32 to vector<1x128xf32>
    %26 = arith.addf %25, %24 : vector<1x128xf32>
    %cst_19 = arith.constant 1.000000e+00 : f32
    %27 = vector.broadcast %cst_19 : f32 to vector<1x128xf32>
    %28 = arith.divf %27, %26 : vector<1x128xf32>
    %c0_20 = arith.constant 0 : index
    %c0_21 = arith.constant 0 : index
    %29 = vector.load %arg8[%c0_20, %c0_21] : memref<1x128xf32, #tpu.memory_space<vmem>>, vector<1x128xf32>
    tpu.vector_store %arg8[%c0_20, %c0_21], %28 {strides = array<i32>} : memref<1x128xf32, #tpu.memory_space<vmem>>, vector<1x128xf32>,
    return
  }
  func.func @transform_0(%arg0: i32) -> (i32, i32) {
    %c0_i32 = arith.constant 0 : i32
    %c0_i32_0 = arith.constant 0 : i32
    return %arg0, %c0_i32 : i32, i32
  }
  func.func @transform_1(%arg0: i32) -> (i32, i32) {
    %c0_i32 = arith.constant 0 : i32
    %c0_i32_0 = arith.constant 0 : i32
    %c0_i32_1 = arith.constant 0 : i32
    return %c0_i32, %c0_i32_0 : i32, i32
  }
  func.func @transform_2(%arg0: i32) -> (i32, i32) {
    %c0_i32 = arith.constant 0 : i32
    %c0_i32_0 = arith.constant 0 : i32
    %c0_i32_1 = arith.constant 0 : i32
    return %c0_i32, %c0_i32_0 : i32, i32
  }
  func.func @transform_3(%arg0: i32) -> (i32, i32) {
    %c0_i32 = arith.constant 0 : i32
    %c0_i32_0 = arith.constant 0 : i32
    %c0_i32_1 = arith.constant 0 : i32
    return %c0_i32, %c0_i32_0 : i32, i32
  }
  func.func @transform_4(%arg0: i32) -> (i32, i32) {
    %c0_i32 = arith.constant 0 : i32
    %c0_i32_0 = arith.constant 0 : i32
    %c0_i32_1 = arith.constant 0 : i32
    return %c0_i32, %c0_i32_0 : i32, i32
  }
  func.func @transform_5(%arg0: i32) -> (i32, i32) {
    %c0_i32 = arith.constant 0 : i32
    %c0_i32_0 = arith.constant 0 : i32
    %c0_i32_1 = arith.constant 0 : i32
    return %c0_i32, %c0_i32_0 : i32, i32
  }
  func.func @transform_6(%arg0: i32) -> (i32, i32) {
    %c0_i32 = arith.constant 0 : i32
    %c0_i32_0 = arith.constant 0 : i32
    %c0_i32_1 = arith.constant 0 : i32
    return %c0_i32, %c0_i32_0 : i32, i32
  }
  func.func @transform_7(%arg0: i32) -> (i32, i32) {
    %c0_i32 = arith.constant 0 : i32
    %c0_i32_0 = arith.constant 0 : i32
    return %c0_i32, %arg0 : i32, i32
  }
}

</mosaic_0001>

<bundles_post_ra>
// kernel: relation_model_forward.1
= control target key start
LH: loop header
LB: loop body
LE: loop exit
PB: predicated region body
PF: predicated region fallthrough
CT: control target
= control target key end

     0   :  { %s2009_s26 = smov 0   ;;  %s2540_s0 = inlined_call_operand.vmem [shape: bf16[256,128], index: 0, kind: input, shape index: {}]   ;;  %s2541_s1 = inlined_call_operand.vmem [shape: bf16[256,128], index: 1, kind: input, shape index: {}]   ;;  %s2542_s2 = inlined_call_operand.vmem [shape: f32[256,1], index: 2, kind: input, shape index: {}]   ;;  %s2543_s3 = inlined_call_operand.vmem [shape: bf16[256,256], index: 3, kind: input, shape index: {}]   ;;  %s2544_s4 = inlined_call_operand.vmem [shape: f32[256,1], index: 4, kind: input, shape index: {}]   ;;  %s2545_s5 = inlined_call_operand.vmem [shape: bf16[1,256], index: 5, kind: input, shape index: {}]   ;;  %s2546_s6 = inlined_call_operand.<no memory space> [shape: f32[1,1], index: 6, kind: input, shape index: {}]   ;;  %s2547_s7 = inlined_call_operand.vmem [shape: f32[1,256], index: 7, kind: output, shape index: {}]  }
   0x1   :  { %v12_v0 = vstv %s2546_s6 }
   0x2   :  { %13 = vst [vmem:[#allocation2] sm:$0x1] %v12_v0 }
   0x3 LB: > { %s2015_s27 = sadd.s32 4294967295, %s1962_s26   ;;  %p1600_p0 = scmp.ge.s32.totalorder %s1962_s26, 1  ;;  %s1962_s26 = sphi %s2009_s26, %s19_s26  }
   0x4   : > { %p240_p1 = scmp.lt.s32.totalorder %s1962_s26, 3 }
   0x6   : > { %p241_p2 = pnand %p1600_p0, %p240_p1 }
   0x7   : > { %s1601_s28 = sshll.u32 (!%p241_p2), %s2015_s27, 4  ;;  %v344_v1 = vld [vmem:[%s2542_s2 + $0x80] sm:$0xff] (!%p241_p2)  ;;  %v1964_v3 = vmov (!%p241_p2), 0   ;;  %v345_v4 = vld [vmem:[%s2542_s2 + $0x88] sm:$0xff] (!%p241_p2)  ;;  %v346_v6 = vld [vmem:[%s2542_s2 + $0x90] sm:$0xff] (!%p241_p2)  ;;  %p276_p4 = scmp.lt.s32.totalorder (!%p241_p2), %s2015_s27, 1 }
   0x8   : > { %244 = sbr.rel (%p241_p2) target bundleno = 961 (0x3c1), region = 48  ;;  %v328_v2 = vld [vmem:[%s2542_s2] sm:$0xff] (!%p241_p2)  ;;  %p271_p3 = scmp.lt.s32.totalorder (!%p241_p2), %s1601_s28, 31  ;;  %1878 = vset.pattern.permute.xlu0 (!%p241_p2), %v1964_v3  ;;  %1879 = vset.pattern.permute.xlu1 (!%p241_p2), %v1964_v3  ;;  %v329_v5 = vld [vmem:[%s2542_s2 + $0x8] sm:$0xff] (!%p241_p2)  ;;  %v347_v7 = vld [vmem:[%s2542_s2 + $0x98] sm:$0xff] (!%p241_p2) }
   0x9   : > { %442 = vperm.xlu0 (!%p241_p2), %1878, %v344_v1   ;;  %362 = vperm.xlu1 (!%p241_p2), %1879, %v328_v2   ;;  %v330_v10 = vld [vmem:[%s2542_s2 + $0x10] sm:$0xff] (!%p241_p2)  ;;  %v331_v11 = vld [vmem:[%s2542_s2 + $0x18] sm:$0xff] (!%p241_p2)  ;;  %v348_v13 = vld [vmem:[%s2542_s2 + $0xa0] sm:$0xff] (!%p241_p2) }
   0xa   : > { %v1888_v14 = vld [vmem:[%s2541_s1] sm:$0xff] (!%p241_p2)   ;;  %v349_v15 = vld [vmem:[%s2542_s2 + $0xa8] sm:$0xff] (!%p241_p2)  ;;  %v350_v19 = vld [vmem:[%s2542_s2 + $0xb0] sm:$0xff] (!%p241_p2) }
   0xb   : > { %1836 = vmatprep.mubr.bf16.mxu0 (!%p241_p2), %v1888_v14  ;;  %v332_v16 = vld [vmem:[%s2542_s2 + $0x20] sm:$0xff] (!%p241_p2)  ;;  %v333_v17 = vld [vmem:[%s2542_s2 + $0x28] sm:$0xff] (!%p241_p2)  ;;  %v351_v20 = vld [vmem:[%s2542_s2 + $0xb8] sm:$0xff] (!%p241_p2) }
   0xc   : > { %v334_v21 = vld [vmem:[%s2542_s2 + $0x30] sm:$0xff] (!%p241_p2)  ;;  %v335_v22 = vld [vmem:[%s2542_s2 + $0x38] sm:$0xff] (!%p241_p2)  ;;  %v352_v23 = vld [vmem:[%s2542_s2 + $0xc0] sm:$0xff] (!%p241_p2) }
   0xd   : > { %447 = vperm.xlu0 (!%p241_p2), %1878, %v345_v4   ;;  %367 = vperm.xlu1 (!%p241_p2), %1879, %v329_v5   ;;  %v353_v25 = vld [vmem:[%s2542_s2 + $0xc8] sm:$0xff] (!%p241_p2)  ;;  %v336_v26 = vld [vmem:[%s2542_s2 + $0x40] sm:$0xff] (!%p241_p2)  ;;  %v354_v29 = vld [vmem:[%s2542_s2 + $0xd0] sm:$0xff] (!%p241_p2) }
   0xe   : > { %v337_v27 = vld [vmem:[%s2542_s2 + $0x48] sm:$0xff] (!%p241_p2)  ;;  %v355_v30 = vld [vmem:[%s2542_s2 + $0xd8] sm:$0xff] (!%p241_p2)  ;;  %v338_v31 = vld [vmem:[%s2542_s2 + $0x50] sm:$0xff] (!%p241_p2) }
   0xf   : > { %s2549_s28 = smov (!%p271_p3, %s1601_s28), 31  ;;  %v339_v32 = vld [vmem:[%s2542_s2 + $0x58] sm:$0xff]  ;;  %v356_v34 = vld [vmem:[%s2542_s2 + $0xe0] sm:$0xff]  ;;  %v357_v35 = vld [vmem:[%s2542_s2 + $0xe8] sm:$0xff]  ;;  %s2551_s27 = smov (!%p276_p4, %s2015_s27), 1 }
  0x10   : > { %s1602_s13 = sshll.u32 %s2549_s28, 2  ;;  %v340_v36 = vld [vmem:[%s2542_s2 + $0x60] sm:$0xff]  ;;  %v341_v37 = vld [vmem:[%s2542_s2 + $0x68] sm:$0xff]  ;;  %v358_v39 = vld [vmem:[%s2542_s2 + $0xf0] sm:$0xff]  ;;  %s278_s19 = scalar_lea.vmem %s2547_s7, %s2551_s27 }
  0x11   : > { %s2038_s18 = scalar_lea.vmem %s2540_s0, %s1602_s13  ;;  %452 = vperm.xlu0 %1878, %v346_v6   ;;  %457 = vperm.xlu1 %1879, %v347_v7   ;;  %v359_v40 = vld [vmem:[%s2542_s2 + $0xf8] sm:$0xff]  ;;  %v342_v41 = vld [vmem:[%s2542_s2 + $0x70] sm:$0xff]  ;;  %v921_v43 = vld [vmem:[%s2544_s4 + $0x80] sm:$0xff] }
  0x12   : > { %v1880_v8 = vld [vmem:[%s2038_s18] sm:$0xff]   ;;  %v1881_v9 = vld [vmem:[%s2038_s18 + $0x8] sm:$0xff]   ;;  %v1882_v12 = vld [vmem:[%s2038_s18 + $0x10] sm:$0xff]  }
  0x13   : > { %1820 = vmatprep.subr.bf16.mxu0 %v1880_v8  ;;  %v1883_v18 = vld [vmem:[%s2038_s18 + $0x18] sm:$0xff]   ;;  %v1884_v24 = vld [vmem:[%s2038_s18 + $0x20] sm:$0xff]   ;;  %v1885_v28 = vld [vmem:[%s2038_s18 + $0x28] sm:$0xff]  }
  0x14   : > { %1821 = vmatpush3.bf16.xpose.msra.mxu0 %v1880_v8  ;;  %v1886_v33 = vld [vmem:[%s2038_s18 + $0x30] sm:$0xff]   ;;  %v1887_v38 = vld [vmem:[%s2038_s18 + $0x38] sm:$0xff]   ;;  %v922_v44 = vld [vmem:[%s2544_s4 + $0x88] sm:$0xff] }
  0x15   : > { %1822 = vmatprep.subr.bf16.mxu0 %v1881_v9  ;;  %372 = vperm.xlu0 %1878, %v330_v10   ;;  %v343_v42 = vld [vmem:[%s2542_s2 + $0x78] sm:$0xff]  ;;  %v905_v45 = vld [vmem:[%s2544_s4] sm:$0xff]  ;;  %v906_v46 = vld [vmem:[%s2544_s4 + $0x8] sm:$0xff] }
  0x16   : > { %377 = vperm.xlu1 %1879, %v331_v11   ;;  %v1889_v47 = vld [vmem:[%s2541_s1 + $0x8] sm:$0xff]   ;;  %v1890_v48 = vld [vmem:[%s2541_s1 + $0x10] sm:$0xff]   ;;  %v924_v50 = vld [vmem:[%s2544_s4 + $0x98] sm:$0xff] }
  0x17   : > { %v923_v49 = vld [vmem:[%s2544_s4 + $0x90] sm:$0xff]  ;;  %v908_v52 = vld [vmem:[%s2544_s4 + $0x18] sm:$0xff]  ;;  %v1892_v54 = vld [vmem:[%s2541_s1 + $0x20] sm:$0xff]  }
  0x18   : > { %v907_v51 = vld [vmem:[%s2544_s4 + $0x10] sm:$0xff]  ;;  %v1891_v53 = vld [vmem:[%s2541_s1 + $0x18] sm:$0xff]   ;;  %v925_v55 = vld [vmem:[%s2544_s4 + $0xa0] sm:$0xff] }
  0x19   : > { %462 = vperm.xlu0 %1878, %v348_v13   ;;  %v926_v56 = vld [vmem:[%s2544_s4 + $0xa8] sm:$0xff]  ;;  %v909_v57 = vld [vmem:[%s2544_s4 + $0x20] sm:$0xff]  ;;  %v1894_v60 = vld [vmem:[%s2541_s1 + $0x30] sm:$0xff]  }
  0x1a   : > { %467 = vperm.xlu1 %1879, %v349_v15   ;;  %v910_v58 = vld [vmem:[%s2544_s4 + $0x28] sm:$0xff]  ;;  %v927_v61 = vld [vmem:[%s2544_s4 + $0xb0] sm:$0xff]  ;;  %v928_v62 = vld [vmem:[%s2544_s4 + $0xb8] sm:$0xff] }
  0x1b   : > { %v1893_v59 = vld [vmem:[%s2541_s1 + $0x28] sm:$0xff]   ;;  %v911_v63 = vld [vmem:[%s2544_s4 + $0x30] sm:$0xff]  ;;  %v912_v0 = vld [vmem:[%s2544_s4 + $0x38] sm:$0xff] }
  0x1c   : > { %1823 = vmatpush3.bf16.xpose.msra.mxu0 %v1881_v9  ;;  %v1895_v1 = vld [vmem:[%s2541_s1 + $0x38] sm:$0xff]   ;;  %v1896_v2 = vld [vmem:[%s2541_s1 + $0x40] sm:$0xff]   ;;  %v930_v4 = vld [vmem:[%s2544_s4 + $0xc8] sm:$0xff] }
  0x1d   : > { %1824 = vmatprep.subr.bf16.mxu0 %v1882_v12  ;;  %382 = vperm.xlu0 %1878, %v332_v16   ;;  %v929_v3 = vld [vmem:[%s2544_s4 + $0xc0] sm:$0xff]  ;;  %v914_v6 = vld [vmem:[%s2544_s4 + $0x48] sm:$0xff]  ;;  %v1898_v8 = vld [vmem:[%s2541_s1 + $0x50] sm:$0xff]  }
  0x1e   : > { %387 = vperm.xlu1 %1879, %v333_v17   ;;  %v913_v5 = vld [vmem:[%s2544_s4 + $0x40] sm:$0xff]  ;;  %v1897_v7 = vld [vmem:[%s2541_s1 + $0x48] sm:$0xff]   ;;  %v931_v9 = vld [vmem:[%s2544_s4 + $0xd0] sm:$0xff] }
  0x1f   : > { %v932_v10 = vld [vmem:[%s2544_s4 + $0xd8] sm:$0xff]  ;;  %v915_v11 = vld [vmem:[%s2544_s4 + $0x50] sm:$0xff]  ;;  %v1900_v14 = vld [vmem:[%s2541_s1 + $0x60] sm:$0xff]  }
  0x20   : > { %v1899_v13 = vld [vmem:[%s2541_s1 + $0x58] sm:$0xff]   ;;  %v933_v15 = vld [vmem:[%s2544_s4 + $0xe0] sm:$0xff]  ;;  %v934_v16 = vld [vmem:[%s2544_s4 + $0xe8] sm:$0xff] }
  0x21   : > { %472 = vperm.xlu0 %1878, %v350_v19   ;;  %v917_v17 = vld [vmem:[%s2544_s4 + $0x60] sm:$0xff]  ;;  %v1901_v19 = vld [vmem:[%s2541_s1 + $0x68] sm:$0xff]  }
  0x22   : > { %477 = vperm.xlu1 %1879, %v351_v20   ;;  %v1902_v20 = vld [vmem:[%s2541_s1 + $0x70] sm:$0xff]  }
  0x24   : > { %1825 = vmatpush3.bf16.xpose.msra.mxu0 %v1882_v12  ;;  %v916_v12 = vld [vmem:[%s2544_s4 + $0x58] sm:$0xff] }
  0x25   : > { %1826 = vmatprep.subr.bf16.mxu0 %v1883_v18  ;;  %392 = vperm.xlu0 %1878, %v334_v21   ;;  %v935_v21 = vld [vmem:[%s2544_s4 + $0xf0] sm:$0xff] }
  0x26   : > { %397 = vperm.xlu1 %1879, %v335_v22   ;;  %v936_v22 = vld [vmem:[%s2544_s4 + $0xf8] sm:$0xff] }
  0x29   : > { %482 = vperm.xlu0 %1878, %v352_v23   ;;  %v919_v23 = vld [vmem:[%s2544_s4 + $0x70] sm:$0xff] }
  0x2a   : > { %487 = vperm.xlu1 %1879, %v353_v25   ;;  %v1903_v25 = vld [vmem:[%s2541_s1 + $0x78] sm:$0xff]  }
  0x2c   : > { %1827 = vmatpush3.bf16.xpose.msra.mxu0 %v1883_v18  ;;  %v918_v18 = vld [vmem:[%s2544_s4 + $0x68] sm:$0xff] }
  0x2d   : > { %1828 = vmatprep.subr.bf16.mxu0 %v1884_v24  ;;  %402 = vperm.xlu0 %1878, %v336_v26   ;;  %v1467_v26 = vld [vmem:[#allocation2] sm:$0x1] }
  0x2e   : > { %407 = vperm.xlu1 %1879, %v337_v27  }
  0x31   : > { %492 = vperm.xlu0 %1878, %v354_v29  }
  0x32   : > { %497 = vperm.xlu1 %1879, %v355_v30  }
  0x34   : > { %1829 = vmatpush3.bf16.xpose.msra.mxu0 %v1884_v24  ;;  %v920_v24 = vld [vmem:[%s2544_s4 + $0x78] sm:$0xff] }
  0x35   : > { %1830 = vmatprep.subr.bf16.mxu0 %v1885_v28  ;;  %412 = vperm.xlu0 %1878, %v338_v31   ;;  %v1906_v31 = vld [vmem:[%s2543_s3 + $0x4] ss:$8 sps:$4 sm:$0xff]  }
  0x36   : > { %417 = vperm.xlu1 %1879, %v339_v32   ;;  %1289 = vmatprep.mubr.bf16.mxu1 %v1906_v31 }
  0x39   : > { %502 = vperm.xlu0 %1878, %v356_v34  }
  0x3a   : > { %507 = vperm.xlu1 %1879, %v357_v35  }
  0x3c   : > { %1831 = vmatpush3.bf16.xpose.msra.mxu0 %v1885_v28 }
  0x3d   : > { %1832 = vmatprep.subr.bf16.mxu0 %v1886_v33  ;;  %422 = vperm.xlu0 %1878, %v340_v36  }
  0x3e   : > { %427 = vperm.xlu1 %1879, %v341_v37  }
  0x41   : > { %512 = vperm.xlu0 %1878, %v358_v39  }
  0x42   : > { %517 = vperm.xlu1 %1879, %v359_v40  }
  0x44   : > { %1833 = vmatpush3.bf16.xpose.msra.mxu0 %v1886_v33 }
  0x45   : > { %1834 = vmatprep.subr.bf16.mxu0 %v1887_v38  ;;  %432 = vperm.xlu0 %1878, %v342_v41  }
  0x46   : > { %437 = vperm.xlu1 %1879, %v343_v42  }
  0x49   : > { %1019 = vperm.xlu0 %1878, %v921_v43  }
  0x4a   : > { %1024 = vperm.xlu1 %1879, %v922_v44  }
  0x4c   : > { %1835 = vmatpush3.bf16.xpose.msra.mxu0 %v1887_v38 }
  0x4d   : > { %939 = vperm.xlu0 %1878, %v905_v45  }
  0x4e   : > { %944 = vperm.xlu1 %1879, %v906_v46  }
  0x51   : > { %1029 = vperm.xlu0 %1878, %v923_v49  }
  0x52   : > { %1034 = vperm.xlu1 %1879, %v924_v50  }
  0x53   : > { %1837 = vmatmul.mubr.bf16.vlgmr.msra.gmra.mrb[0].mxu0 %v1889_v47 }
  0x54   : > { %1840 = vmatprep.mubr.bf16.mxu0 %v1890_v48 }
  0x55   : > { %949 = vperm.xlu0 %1878, %v907_v51  }
  0x56   : > { %954 = vperm.xlu1 %1879, %v908_v52  }
  0x59   : > { %1039 = vperm.xlu0 %1878, %v925_v55  }
  0x5a   : > { %1044 = vperm.xlu1 %1879, %v926_v56  }
  0x5b   : > { %1841 = vmatmul.mubr.bf16.gmra.mrb[4].mxu0 %v1891_v53 }
  0x5c   : > { %1844 = vmatprep.mubr.bf16.mxu0 %v1892_v54 }
  0x5d   : > { %959 = vperm.xlu0 %1878, %v909_v57  }
  0x5e   : > { %964 = vperm.xlu1 %1879, %v910_v58  }
  0x61   : > { %1049 = vperm.xlu0 %1878, %v927_v61  }
  0x62   : > { %1054 = vperm.xlu1 %1879, %v928_v62  }
  0x63   : > { %1845 = vmatmul.mubr.bf16.gmra.mrb[8].mxu0 %v1893_v59 }
  0x64   : > { %1848 = vmatprep.mubr.bf16.mxu0 %v1894_v60 }
  0x65   : > { %969 = vperm.xlu0 %1878, %v911_v63  }
  0x66   : > { %974 = vperm.xlu1 %1879, %v912_v0  }
  0x69   : > { %1059 = vperm.xlu0 %1878, %v929_v3  }
  0x6a   : > { %1064 = vperm.xlu1 %1879, %v930_v4  }
  0x6b   : > { %1849 = vmatmul.mubr.bf16.gmra.mrb[12].mxu0 %v1895_v1 }
  0x6c   : > { %1852 = vmatprep.mubr.bf16.mxu0 %v1896_v2 }
  0x6d   : > { %979 = vperm.xlu0 %1878, %v913_v5  }
  0x6e   : > { %984 = vperm.xlu1 %1879, %v914_v6  }
  0x71   : > { %1069 = vperm.xlu0 %1878, %v931_v9  }
  0x72   : > { %1074 = vperm.xlu1 %1879, %v932_v10  }
  0x73   : > { %1853 = vmatmul.mubr.bf16.gmra.mrb[16].mxu0 %v1897_v7 }
  0x74   : > { %1856 = vmatprep.mubr.bf16.mxu0 %v1898_v8 }
  0x75   : > { %989 = vperm.xlu0 %1878, %v915_v11  }
  0x76   : > { %994 = vperm.xlu1 %1879, %v916_v12  }
  0x79   : > { %1079 = vperm.xlu0 %1878, %v933_v15  }
  0x7a   : > { %1084 = vperm.xlu1 %1879, %v934_v16  }
  0x7b   : > { %1857 = vmatmul.mubr.bf16.gmra.mrb[20].mxu0 %v1899_v13 }
  0x7c   : > { %1860 = vmatprep.mubr.bf16.mxu0 %v1900_v14 }
  0x7d   : > { %999 = vperm.xlu0 %1878, %v917_v17  }
  0x7e   : > { %1004 = vperm.xlu1 %1879, %v918_v18  }
  0x81   : > { %1089 = vperm.xlu0 %1878, %v935_v21  }
  0x82   : > { %1094 = vperm.xlu1 %1879, %v936_v22  }
  0x83   : > { %1861 = vmatmul.mubr.bf16.gmra.mrb[24].mxu0 %v1901_v19 }
  0x84   : > { %1864 = vmatprep.mubr.bf16.mxu0 %v1902_v20 }
  0x85   : > { %1009 = vperm.xlu0 %1878, %v919_v23  }
  0x86   : > { %1014 = vperm.xlu1 %1879, %v920_v24  }
  0x88   : > { %v2273_v27 = vpop.permute.xlu0 %442  ;;  %v363_v28 = vpop.permute.xlu1 %362 }
  0x89   : > { %1470 = vperm.xlu0 %1878, %v1467_v26  }
  0x8b   : > { %1865 = vmatmul.mubr.bf16.gmra.mrb[28].mxu0 %v1903_v25 }
  0x8c   : > { %v2275_v29 = vpop.permute.xlu0 %447  ;;  %v368_v30 = vpop.permute.xlu1 %367 }
  0x90   : > { %v2280_v32 = vpop.permute.xlu0 %452  ;;  %v2282_v33 = vpop.permute.xlu1 %457 }
  0x94   : > { %v373_v34 = vpop.permute.xlu0 %372 }
  0x95   : > { %v378_v35 = vpop.permute.xlu1 %377 }
  0x98   : > { %v2284_v36 = vpop.permute.xlu0 %462 }
  0x99   : > { %v2286_v37 = vpop.permute.xlu1 %467 }
  0x9c   : > { %v383_v38 = vpop.permute.xlu0 %382 }
  0x9d   : > { %v388_v39 = vpop.permute.xlu1 %387 }
  0xa0   : > { %v2288_v40 = vpop.permute.xlu0 %472 }
  0xa1   : > { %v2290_v41 = vpop.permute.xlu1 %477 }
  0xa4   : > { %v393_v42 = vpop.permute.xlu0 %392 }
  0xa5   : > { %v398_v43 = vpop.permute.xlu1 %397 }
  0xa8   : > { %v2292_v44 = vpop.permute.xlu0 %482 }
  0xa9   : > { %v2294_v45 = vpop.permute.xlu1 %487 }
  0xac   : > { %v403_v46 = vpop.permute.xlu0 %402 }
  0xad   : > { %v408_v47 = vpop.permute.xlu1 %407 }
  0xb0   : > { %v2296_v48 = vpop.permute.xlu0 %492 }
  0xb1   : > { %v2298_v49 = vpop.permute.xlu1 %497 }
  0xb4   : > { %v413_v50 = vpop.permute.xlu0 %412 }
  0xb5   : > { %v418_v54 = vpop.permute.xlu1 %417 }
  0xb8   : > { %v2300_v62 = vpop.permute.xlu0 %502 }
  0xb9   : > { %v2304_v2 = vpop.permute.xlu1 %507 }
  0xbc   : > { %v423_v11 = vpop.permute.xlu0 %422 }
  0xbd   : > { %v428_v15 = vpop.permute.xlu1 %427 }
  0xc0   : > { %v2312_v23 = vpop.permute.xlu0 %512 }
 0x126   : > { %v1838_v51 = vpop.f32.mrb[0].mxu0 }
 0x127   : > { %v707_v52 = vadd.f32 %v1838_v51, %v373_v34  ;;  %v698_v53 = vpop.f32.mrb[1].mxu0 }
 0x128   : > { %v699_v55 = vadd.f32 %v698_v53, %v363_v28  ;;  %v1839_v56 = vpop.f32.mrb[2].mxu0 }
 0x129   : > { %v710_v57 = vadd.f32 %v1839_v56, %v378_v35  ;;  %v701_v58 = vpop.f32.mrb[3].mxu0  ;;  %v827_v60 = vmax.f32 %v707_v52, 0.0 }
 0x12a   : > { %v702_v59 = vadd.f32 %v701_v58, %v368_v30  ;;  %v825_v63 = vmax.f32 %v699_v55, 0.0  ;;  %v2314_v30 = vpop.permute.xlu1 %517 }
 0x12b   : > { %v828_v61 = vmax.f32 %v710_v57, 0.0 }
 0x12c   : > { %v826_v0 = vmax.f32 %v702_v59, 0.0 }
 0x12d   : > { %v2302_v1 = vpack.c.bf16 %v828_v61, %v827_v60 }
 0x12e   : > { %v1842_v3 = vpop.f32.mrb[4].mxu0  ;;  %v2306_v4 = vpack.c.bf16 %v826_v0, %v825_v63  ;;  %v438_v55 = vpop.permute.xlu1 %437 }
 0x12f   : > { %v723_v5 = vadd.f32 %v1842_v3, %v393_v42  ;;  %v714_v6 = vpop.f32.mrb[5].mxu0 }
 0x130   : > { %v715_v7 = vadd.f32 %v714_v6, %v383_v38  ;;  %v1843_v8 = vpop.f32.mrb[6].mxu0 }
 0x131   : > { %v726_v9 = vadd.f32 %v1843_v8, %v398_v43  ;;  %v717_v10 = vpop.f32.mrb[7].mxu0  ;;  %v831_v13 = vmax.f32 %v723_v5, 0.0  ;;  %v433_v43 = vpop.permute.xlu0 %432 }
 0x132   : > { %v718_v12 = vadd.f32 %v717_v10, %v388_v39  ;;  %v829_v16 = vmax.f32 %v715_v7, 0.0 }
 0x133   : > { %v832_v14 = vmax.f32 %v726_v9, 0.0 }
 0x134   : > { %v830_v17 = vmax.f32 %v718_v12, 0.0 }
 0x135   : > { %v2308_v18 = vpack.c.bf16 %v832_v14, %v831_v13 }
 0x136   : > { %v2310_v19 = vpack.c.bf16 %v830_v17, %v829_v16  ;;  %v1846_v20 = vpop.f32.mrb[8].mxu0 }
 0x137   : > { %v739_v21 = vadd.f32 %v1846_v20, %v413_v50  ;;  %v730_v22 = vpop.f32.mrb[9].mxu0 }
 0x138   : > { %v731_v24 = vadd.f32 %v730_v22, %v403_v46  ;;  %v1847_v25 = vpop.f32.mrb[10].mxu0 }
 0x139   : > { %v742_v26 = vadd.f32 %v1847_v25, %v418_v54  ;;  %v733_v28 = vpop.f32.mrb[11].mxu0  ;;  %v835_v34 = vmax.f32 %v739_v21, 0.0 }
 0x13a   : > { %v734_v31 = vadd.f32 %v733_v28, %v408_v47  ;;  %v833_v38 = vmax.f32 %v731_v24, 0.0 }
 0x13b   : > { %v836_v35 = vmax.f32 %v742_v26, 0.0 }
 0x13c   : > { %v834_v39 = vmax.f32 %v734_v31, 0.0 }
 0x13d   : > { %v2316_v42 = vpack.c.bf16 %v836_v35, %v835_v34 }
 0x13e   : > { %v2318_v51 = vpack.c.bf16 %v834_v39, %v833_v38  ;;  %v1850_v50 = vpop.f32.mrb[12].mxu0 }
 0x13f   : > { %v755_v52 = vadd.f32 %v1850_v50, %v433_v43  ;;  %v746_v53 = vpop.f32.mrb[13].mxu0 }
 0x140   : > { %v747_v46 = vadd.f32 %v746_v53, %v423_v11  ;;  %v1851_v56 = vpop.f32.mrb[14].mxu0 }
 0x141   : > { %v758_v54 = vadd.f32 %v1851_v56, %v438_v55  ;;  %v749_v57 = vpop.f32.mrb[15].mxu0  ;;  %v839_v59 = vmax.f32 %v755_v52, 0.0 }
 0x142   : > { %v750_v58 = vadd.f32 %v749_v57, %v428_v15  ;;  %v837_v60 = vmax.f32 %v747_v46, 0.0 }
 0x143   : > { %v840_v47 = vmax.f32 %v758_v54, 0.0 }
 0x144   : > { %v838_v61 = vmax.f32 %v750_v58, 0.0 }
 0x145   : > { %v2320_v63 = vpack.c.bf16 %v840_v47, %v839_v59 }
 0x146   : > { %v2322_v0 = vpack.c.bf16 %v838_v61, %v837_v60  ;;  %v1854_v3 = vpop.f32.mrb[16].mxu0  ;;  %v1913_v61 = vld [vmem:[%s2543_s3 + $0x34] ss:$8 sps:$4 sm:$0xff]  }
 0x147   : > { %v771_v5 = vadd.f32 %v1854_v3, %v2280_v32  ;;  %v762_v6 = vpop.f32.mrb[17].mxu0  ;;  %v1918_v3 = vld [vmem:[%s2543_s3 + $0x40] ss:$8 sps:$4 sm:$0xff]  }
 0x148   : > { %v763_v7 = vadd.f32 %v762_v6, %v2273_v27  ;;  %v1855_v8 = vpop.f32.mrb[18].mxu0  ;;  %v1921_v6 = vld [vmem:[%s2543_s3 + $0x50] ss:$8 sps:$4 sm:$0xff]  }
 0x149   : > { %v774_v9 = vadd.f32 %v1855_v8, %v2282_v33  ;;  %v765_v10 = vpop.f32.mrb[19].mxu0  ;;  %v843_v12 = vmax.f32 %v771_v5, 0.0  ;;  %v1919_v5 = vld [vmem:[%s2543_s3 + $0x54] ss:$8 sps:$4 sm:$0xff]   ;;  %v1924_v8 = vld [vmem:[%s2543_s3 + $0x60] ss:$8 sps:$4 sm:$0xff]  }
 0x14a   : > { %v766_v11 = vadd.f32 %v765_v10, %v2275_v29  ;;  %v841_v14 = vmax.f32 %v763_v7, 0.0  ;;  %v1922_v7 = vld [vmem:[%s2543_s3 + $0x64] ss:$8 sps:$4 sm:$0xff]   ;;  %v1927_v10 = vld [vmem:[%s2543_s3 + $0x70] ss:$8 sps:$4 sm:$0xff]  }
 0x14b   : > { %v844_v13 = vmax.f32 %v774_v9, 0.0  ;;  %v1925_v9 = vld [vmem:[%s2543_s3 + $0x74] ss:$8 sps:$4 sm:$0xff]  }
 0x14c   : > { %v842_v15 = vmax.f32 %v766_v11, 0.0  ;;  %v1928_v11 = vld [vmem:[%s2543_s3 + $0x84] ss:$8 sps:$4 sm:$0xff]  }
 0x14d   : > { %v898_v16 = vpack.c.bf16 %v844_v13, %v843_v12  ;;  %v1930_v12 = vld [vmem:[%s2543_s3 + $0x80] ss:$8 sps:$4 sm:$0xff]   ;;  %v1931_v13 = vld [vmem:[%s2543_s3 + $0x94] ss:$8 sps:$4 sm:$0xff]  }
 0x14e   : > { %v1858_v17 = vpop.f32.mrb[20].mxu0  ;;  %v897_v20 = vpack.c.bf16 %v842_v15, %v841_v14  ;;  %v1933_v14 = vld [vmem:[%s2543_s3 + $0x90] ss:$8 sps:$4 sm:$0xff]   ;;  %v1934_v15 = vld [vmem:[%s2543_s3 + $0xa4] ss:$8 sps:$4 sm:$0xff]  }
 0x14f   : > { %v787_v21 = vadd.f32 %v1858_v17, %v2288_v40  ;;  %v778_v22 = vpop.f32.mrb[21].mxu0  ;;  %v1937_v17 = vld [vmem:[%s2543_s3 + $0xb4] ss:$8 sps:$4 sm:$0xff]  }
 0x150   : > { %v779_v32 = vadd.f32 %v778_v22, %v2284_v36  ;;  %v1859_v24 = vpop.f32.mrb[22].mxu0  ;;  %1686 = vmatprep.subr.bf16.mxu1 %v897_v20  ;;  %v1939_v20 = vld [vmem:[%s2543_s3 + $0xb0] ss:$8 sps:$4 sm:$0xff]   ;;  %v1942_v22 = vld [vmem:[%s2543_s3 + $0xc0] ss:$8 sps:$4 sm:$0xff]  }
 0x151   : > { %v790_v27 = vadd.f32 %v1859_v24, %v2290_v41  ;;  %v781_v33 = vpop.f32.mrb[23].mxu0  ;;  %1687 = vmatpush3.bf16.msra.mxu1 %v2306_v4  ;;  %v847_v25 = vmax.f32 %v787_v21, 0.0  ;;  %v1940_v21 = vld [vmem:[%s2543_s3 + $0xc4] ss:$8 sps:$4 sm:$0xff]   ;;  %v1945_v24 = vld [vmem:[%s2543_s3 + $0xd0] ss:$8 sps:$4 sm:$0xff]  }
 0x152   : > { %v782_v29 = vadd.f32 %v781_v33, %v2286_v37  ;;  %1688 = vmatprep.subr.bf16.mxu1 %v898_v16  ;;  %v845_v28 = vmax.f32 %v779_v32, 0.0  ;;  %v1936_v16 = vld [vmem:[%s2543_s3 + $0xa0] ss:$8 sps:$4 sm:$0xff]   ;;  %v1943_v32 = vld [vmem:[%s2543_s3 + $0xd4] ss:$8 sps:$4 sm:$0xff]  }
 0x153   : > { %v848_v26 = vmax.f32 %v790_v27, 0.0  ;;  %v1946_v27 = vld [vmem:[%s2543_s3 + $0xe4] ss:$8 sps:$4 sm:$0xff]   ;;  %v1948_v33 = vld [vmem:[%s2543_s3 + $0xe0] ss:$8 sps:$4 sm:$0xff]  }
 0x154   : > { %v846_v31 = vmax.f32 %v782_v29, 0.0  ;;  %v1949_v29 = vld [vmem:[%s2543_s3 + $0xf4] ss:$8 sps:$4 sm:$0xff]  }
 0x155   : > { %v900_v34 = vpack.c.bf16 %v848_v26, %v847_v25  ;;  %1689 = vmatpush3.bf16.msra.mxu1 %v2302_v1  ;;  %v1951_v25 = vld [vmem:[%s2543_s3 + $0xf0] ss:$8 sps:$4 sm:$0xff]   ;;  %v2441_v26 = vpop.permute.xlu0 %1019 }
 0x156   : > { %v899_v40 = vpack.c.bf16 %v846_v31, %v845_v28  ;;  %v1862_v35 = vpop.f32.mrb[24].mxu0  ;;  %v2443_v28 = vpop.permute.xlu1 %1024 }
 0x157   : > { %v803_v36 = vadd.f32 %v1862_v35, %v2296_v48  ;;  %v794_v38 = vpop.f32.mrb[25].mxu0 }
 0x158   : > { %v795_v41 = vadd.f32 %v794_v38, %v2292_v44  ;;  %v1863_v39 = vpop.f32.mrb[26].mxu0  ;;  %1690 = vmatprep.subr.bf16.mxu1 %v899_v40 }
 0x159   : > { %v806_v4 = vadd.f32 %v1863_v39, %v2298_v49  ;;  %v797_v37 = vpop.f32.mrb[27].mxu0  ;;  %1691 = vmatpush3.bf16.msra.mxu1 %v2310_v19  ;;  %v851_v50 = vmax.f32 %v803_v36, 0.0  ;;  %v940_v31 = vpop.permute.xlu0 %939 }
 0x15a   : > { %v798_v43 = vadd.f32 %v797_v37, %v2294_v45  ;;  %1692 = vmatprep.subr.bf16.mxu1 %v900_v34  ;;  %v849_v1 = vmax.f32 %v795_v41, 0.0  ;;  %v945_v34 = vpop.permute.xlu1 %944 }
 0x15b   : > { %v852_v52 = vmax.f32 %v806_v4, 0.0  ;;  %v1473_v4 = vlaneseq }
 0x15c   : > { %v850_v53 = vmax.f32 %v798_v43, 0.0  ;;  %v1965_v43 = vmov 1966171168  }
 0x15d   : > { %v902_v55 = vpack.c.bf16 %v852_v52, %v851_v50  ;;  %1693 = vmatpush3.bf16.msra.mxu1 %v2308_v18  ;;  %v2445_v40 = vpop.permute.xlu0 %1029  ;;  %v1487_v50 = vunpack.c.l.s4 %v1965_v43 }
 0x15e   : > { %v901_v48 = vpack.c.bf16 %v850_v53, %v849_v1  ;;  %v1866_v46 = vpop.f32.mrb[28].mxu0  ;;  %v2447_v35 = vpop.permute.xlu1 %1034  ;;  %v2453_v53 = vshrl.u32 %v1473_v4, 7 }
 0x15f   : > { %v819_v44 = vadd.f32 %v1866_v46, %v2312_v23  ;;  %v810_v56 = vpop.f32.mrb[29].mxu0 }
 0x160   : > { %v811_v49 = vadd.f32 %v810_v56, %v2300_v62  ;;  %v1867_v54 = vpop.f32.mrb[30].mxu0  ;;  %1694 = vmatprep.subr.bf16.mxu1 %v901_v48  ;;  %v1904_v62 = vld [vmem:[%s2543_s3] ss:$8 sps:$4 sm:$0xff]   ;;  %v1488_v48 = vunpack.c.0.s8 %v1487_v50 }
 0x161   : > { %v822_v19 = vadd.f32 %v1867_v54, %v2314_v30  ;;  %v813_v45 = vpop.f32.mrb[31].mxu0  ;;  %1695 = vmatpush3.bf16.msra.mxu1 %v2318_v51  ;;  %v855_v58 = vmax.f32 %v819_v44, 0.0  ;;  %v1909_v30 = vld [vmem:[%s2543_s3 + $0x10] ss:$8 sps:$4 sm:$0xff]   ;;  %v1912_v51 = vld [vmem:[%s2543_s3 + $0x20] ss:$8 sps:$4 sm:$0xff]   ;;  %v950_v36 = vpop.permute.xlu0 %949 }
 0x162   : > { %v814_v57 = vadd.f32 %v813_v45, %v2304_v2  ;;  %1696 = vmatprep.subr.bf16.mxu1 %v902_v55  ;;  %v853_v18 = vmax.f32 %v811_v49, 0.0  ;;  %v1907_v2 = vld [vmem:[%s2543_s3 + $0x14] ss:$8 sps:$4 sm:$0xff]   ;;  %v955_v38 = vpop.permute.xlu1 %954 }
 0x163   : > { %v856_v59 = vmax.f32 %v822_v19, 0.0  ;;  %v2458_v56 = vld.sshfl [vmem:[%s2545_s5] sm:$0x11 pattern:$0x75316420]  ;;  %v2463_v19 = vsub.s32 %v1488_v48, %v2453_v53 }
 0x164   : > { %v854_v47 = vmax.f32 %v814_v57, 0.0  ;;  %v1485_v54 = vcombine.high %v2458_v56, %v2458_v56 }
 0x165   : > { %v904_v60 = vpack.c.bf16 %v856_v59, %v855_v58  ;;  %1697 = vmatpush3.bf16.msra.mxu1 %v2316_v42  ;;  %v1910_v42 = vld [vmem:[%s2543_s3 + $0x24] ss:$8 sps:$4 sm:$0xff]   ;;  %v2449_v41 = vpop.permute.xlu0 %1039  ;;  %v1492_v59 = vrot.slane %v2458_v56, %v2463_v19 }
 0x166   : > { %v903_v23 = vpack.c.bf16 %v854_v47, %v853_v18  ;;  %v2451_v39 = vpop.permute.xlu1 %1044  ;;  %v1499_v18 = vrot.slane %v1485_v54, %v2463_v19 }
 0x168   : > { %1698 = vmatprep.subr.bf16.mxu1 %v903_v23  ;;  %1534 = vmatprep.mubr.bf16.mxu0 %v1499_v18 }
 0x169   : > { %1699 = vmatpush3.bf16.msra.mxu1 %v2322_v0  ;;  %v1916_v0 = vld [vmem:[%s2543_s3 + $0x44] ss:$8 sps:$4 sm:$0xff]   ;;  %v960_v37 = vpop.permute.xlu0 %959 }
 0x16a   : > { %1700 = vmatprep.subr.bf16.mxu1 %v904_v60  ;;  %v965_v1 = vpop.permute.xlu1 %964 }
 0x16d   : > { %1701 = vmatpush3.bf16.msra.mxu1 %v2320_v63  ;;  %v1915_v63 = vld [vmem:[%s2543_s3 + $0x30] ss:$8 sps:$4 sm:$0xff]   ;;  %v2465_v58 = vpop.permute.xlu0 %1049 }
 0x16e   : > { %v2470_v60 = vpop.permute.xlu1 %1054 }
 0x170   : > { %1290 = vmatmul.mubr.bf16.vlgmr.msra.gmra.mrb[0].mxu1 %v1904_v62 }
 0x171   : > { %1297 = vmatprep.mubr.bf16.mxu1 %v1907_v2 }
 0x178   : > { %1298 = vmatmul.mubr.bf16.gmra.mrb[4].mxu1 %v1909_v30 }
 0x179   : > { %1305 = vmatprep.mubr.bf16.mxu1 %v1910_v42 }
 0x180   : > { %1306 = vmatmul.mubr.bf16.gmra.mrb[8].mxu1 %v1912_v51 }
 0x181   : > { %1313 = vmatprep.mubr.bf16.mxu1 %v1913_v61 }
 0x188   : > { %1314 = vmatmul.mubr.bf16.gmra.mrb[12].mxu1 %v1915_v63  ;;  %v970_v63 = vpop.permute.xlu0 %969 }
 0x189   : > { %1321 = vmatprep.mubr.bf16.mxu1 %v1916_v0 }
 0x190   : > { %1322 = vmatmul.mubr.bf16.gmra.mrb[16].mxu1 %v1918_v3 }
 0x191   : > { %1329 = vmatprep.mubr.bf16.mxu1 %v1919_v5 }
 0x198   : > { %1330 = vmatmul.mubr.bf16.gmra.mrb[20].mxu1 %v1921_v6  ;;  %v975_v6 = vpop.permute.xlu1 %974 }
 0x199   : > { %1337 = vmatprep.mubr.bf16.mxu1 %v1922_v7 }
 0x1a0   : > { %1338 = vmatmul.mubr.bf16.gmra.mrb[24].mxu1 %v1924_v8 }
 0x1a1   : > { %1345 = vmatprep.mubr.bf16.mxu1 %v1925_v9 }
 0x1a8   : > { %1346 = vmatmul.mubr.bf16.gmra.mrb[28].mxu1 %v1927_v10 }
 0x1a9   : > { %1353 = vmatprep.mubr.bf16.mxu1 %v1928_v11  ;;  %v2474_v11 = vpop.permute.xlu0 %1059 }
 0x1b0   : > { %1354 = vmatmul.mubr.bf16.gmra.mrb[32].mxu1 %v1930_v12 }
 0x1b1   : > { %1361 = vmatprep.mubr.bf16.mxu1 %v1931_v13 }
 0x1b8   : > { %1362 = vmatmul.mubr.bf16.gmra.mrb[36].mxu1 %v1933_v14 }
 0x1b9   : > { %1369 = vmatprep.mubr.bf16.mxu1 %v1934_v15 }
 0x1c0   : > { %1370 = vmatmul.mubr.bf16.gmra.mrb[40].mxu1 %v1936_v16  ;;  %v2478_v16 = vpop.permute.xlu1 %1064 }
 0x1c1   : > { %1377 = vmatprep.mubr.bf16.mxu1 %v1937_v17 }
 0x1c8   : > { %1378 = vmatmul.mubr.bf16.gmra.mrb[44].mxu1 %v1939_v20 }
 0x1c9   : > { %1385 = vmatprep.mubr.bf16.mxu1 %v1940_v21 }
 0x1d0   : > { %1386 = vmatmul.mubr.bf16.gmra.mrb[48].mxu1 %v1942_v22 }
 0x1d1   : > { %1393 = vmatprep.mubr.bf16.mxu1 %v1943_v32  ;;  %v980_v32 = vpop.permute.xlu0 %979 }
 0x1d5   : > { %v2482_v50 = vpop.permute.xlu0 %1069 }
 0x1d8   : > { %1394 = vmatmul.mubr.bf16.gmra.mrb[52].mxu1 %v1945_v24 }
 0x1d9   : > { %1401 = vmatprep.mubr.bf16.mxu1 %v1946_v27 }
 0x1e0   : > { %1402 = vmatmul.mubr.bf16.gmra.mrb[56].mxu1 %v1948_v33 }
 0x1e1   : > { %1409 = vmatprep.mubr.bf16.mxu1 %v1949_v29  ;;  %v985_v29 = vpop.permute.xlu1 %984 }
 0x1e8   : > { %1410 = vmatmul.mubr.bf16.gmra.mrb[60].mxu1 %v1951_v25 }
 0x243   : > { %v1702_v52 = vpop.f32.mrb[0].mxu1 }
 0x244   : > { %v1703_v55 = vpop.f32.mrb[1].mxu1 }
 0x245   : > { %v1704_v46 = vadd.f32 %v1703_v55, %v1702_v52  ;;  %v1705_v44 = vpop.f32.mrb[2].mxu1  ;;  %v2484_v55 = vpop.permute.xlu1 %1074 }
 0x246   : > { %v1706_v49 = vpop.f32.mrb[3].mxu1 }
 0x247   : > { %v1292_v45 = vadd.f32 %v1704_v46, %v940_v31  ;;  %v1707_v57 = vadd.f32 %v1706_v49, %v1705_v44 }
 0x249   : > { %v1295_v47 = vadd.f32 %v1707_v57, %v945_v34  ;;  %v1418_v23 = vmax.f32 %v1292_v45, 0.0  ;;  %v990_v45 = vpop.permute.xlu0 %989 }
 0x24b   : > { %v1419_v62 = vmax.f32 %v1295_v47, 0.0  ;;  %v1708_v2 = vpop.f32.mrb[4].mxu1 }
 0x24c   : > { %v1709_v30 = vpop.f32.mrb[5].mxu1 }
 0x24d   : > { %v2472_v42 = vpack.c.bf16 %v1419_v62, %v1418_v23  ;;  %v1710_v51 = vadd.f32 %v1709_v30, %v1708_v2  ;;  %v1711_v61 = vpop.f32.mrb[6].mxu1  ;;  %v995_v23 = vpop.permute.xlu1 %994 }
 0x24e   : > { %v1712_v0 = vpop.f32.mrb[7].mxu1 }
 0x24f   : > { %v1300_v3 = vadd.f32 %v1710_v51, %v950_v36  ;;  %v1713_v5 = vadd.f32 %v1712_v0, %v1711_v61  ;;  %v2488_v61 = vpop.permute.xlu0 %1079 }
 0x251   : > { %v1303_v7 = vadd.f32 %v1713_v5, %v955_v38  ;;  %v1420_v8 = vmax.f32 %v1300_v3, 0.0 }
 0x253   : > { %v1421_v9 = vmax.f32 %v1303_v7, 0.0  ;;  %v1714_v10 = vpop.f32.mrb[8].mxu1 }
 0x254   : > { %v1715_v12 = vpop.f32.mrb[9].mxu1 }
 0x255   : > { %v2476_v13 = vpack.c.bf16 %v1421_v9, %v1420_v8  ;;  %v1716_v14 = vadd.f32 %v1715_v12, %v1714_v10  ;;  %v1717_v15 = vpop.f32.mrb[10].mxu1  ;;  %v1000_v12 = vpop.permute.xlu0 %999 }
 0x256   : > { %v1718_v17 = vpop.f32.mrb[11].mxu1 }
 0x257   : > { %v1308_v20 = vadd.f32 %v1716_v14, %v960_v37  ;;  %v1719_v21 = vadd.f32 %v1718_v17, %v1717_v15 }
 0x259   : > { %v1311_v22 = vadd.f32 %v1719_v21, %v965_v1  ;;  %v1422_v24 = vmax.f32 %v1308_v20, 0.0 }
 0x25b   : > { %v1423_v27 = vmax.f32 %v1311_v22, 0.0  ;;  %v1720_v33 = vpop.f32.mrb[12].mxu1 }
 0x25c   : > { %v1721_v25 = vpop.f32.mrb[13].mxu1 }
 0x25d   : > { %v2480_v31 = vpack.c.bf16 %v1423_v27, %v1422_v24  ;;  %v1722_v34 = vadd.f32 %v1721_v25, %v1720_v33  ;;  %v1723_v36 = vpop.f32.mrb[14].mxu1  ;;  %v2496_v25 = vpop.permute.xlu0 %1089 }
 0x25e   : > { %v1724_v38 = vpop.f32.mrb[15].mxu1 }
 0x25f   : > { %v1316_v4 = vadd.f32 %v1722_v34, %v970_v63  ;;  %v1725_v43 = vadd.f32 %v1724_v38, %v1723_v36 }
 0x261   : > { %v1319_v52 = vadd.f32 %v1725_v43, %v975_v6  ;;  %v1424_v37 = vmax.f32 %v1316_v4, 0.0  ;;  %v2492_v6 = vpop.permute.xlu1 %1084 }
 0x263   : > { %v1425_v1 = vmax.f32 %v1319_v52, 0.0  ;;  %v1726_v48 = vpop.f32.mrb[16].mxu1 }
 0x264   : > { %v1727_v46 = vpop.f32.mrb[17].mxu1 }
 0x265   : > { %v2486_v44 = vpack.c.bf16 %v1425_v1, %v1424_v37  ;;  %v1728_v49 = vadd.f32 %v1727_v46, %v1726_v48  ;;  %v1729_v54 = vpop.f32.mrb[18].mxu1  ;;  %v1005_v20 = vpop.permute.xlu1 %1004 }
 0x266   : > { %v1730_v57 = vpop.f32.mrb[19].mxu1  ;;  %v1010_v46 = vpop.permute.xlu0 %1009 }
 0x267   : > { %v1324_v18 = vadd.f32 %v1728_v49, %v980_v32  ;;  %v1731_v47 = vadd.f32 %v1730_v57, %v1729_v54 }
 0x269   : > { %v1327_v62 = vadd.f32 %v1731_v47, %v985_v29  ;;  %v1426_v2 = vmax.f32 %v1324_v18, 0.0  ;;  %v2498_v36 = vpop.permute.xlu1 %1094 }
 0x26b   : > { %v1427_v30 = vmax.f32 %v1327_v62, 0.0  ;;  %v1732_v51 = vpop.f32.mrb[20].mxu1 }
 0x26c   : > { %v1733_v63 = vpop.f32.mrb[21].mxu1 }
 0x26d   : > { %v2490_v0 = vpack.c.bf16 %v1427_v30, %v1426_v2  ;;  %v1734_v3 = vadd.f32 %v1733_v63, %v1732_v51  ;;  %v1735_v5 = vpop.f32.mrb[22].mxu1  ;;  %v1015_v57 = vpop.permute.xlu1 %1014 }
 0x26e   : > { %v1736_v7 = vpop.f32.mrb[23].mxu1 }
 0x26f   : > { %v1332_v8 = vadd.f32 %v1734_v3, %v990_v45  ;;  %v1737_v9 = vadd.f32 %v1736_v7, %v1735_v5 }
 0x271   : > { %v1335_v10 = vadd.f32 %v1737_v9, %v995_v23  ;;  %v1428_v14 = vmax.f32 %v1332_v8, 0.0 }
 0x273   : > { %v1429_v15 = vmax.f32 %v1335_v10, 0.0  ;;  %v1738_v17 = vpop.f32.mrb[24].mxu1 }
 0x274   : > { %v1739_v21 = vpop.f32.mrb[25].mxu1 }
 0x275   : > { %v2494_v22 = vpack.c.bf16 %v1429_v15, %v1428_v14  ;;  %v1740_v32 = vadd.f32 %v1739_v21, %v1738_v17  ;;  %v1741_v24 = vpop.f32.mrb[26].mxu1 }
 0x276   : > { %v1742_v27 = vpop.f32.mrb[27].mxu1 }
 0x277   : > { %v1340_v33 = vadd.f32 %v1740_v32, %v1000_v12  ;;  %v1743_v29 = vadd.f32 %v1742_v27, %v1741_v24 }
 0x279   : > { %v1343_v34 = vadd.f32 %v1743_v29, %v1005_v20  ;;  %v1430_v38 = vmax.f32 %v1340_v33, 0.0 }
 0x27b   : > { %v1431_v4 = vmax.f32 %v1343_v34, 0.0  ;;  %v1744_v43 = vpop.f32.mrb[28].mxu1 }
 0x27c   : > { %v1745_v52 = vpop.f32.mrb[29].mxu1 }
 0x27d   : > { %v2500_v37 = vpack.c.bf16 %v1431_v4, %v1430_v38  ;;  %v1746_v1 = vadd.f32 %v1745_v52, %v1744_v43  ;;  %v1747_v48 = vpop.f32.mrb[30].mxu1 }
 0x27e   : > { %v1748_v49 = vpop.f32.mrb[31].mxu1 }
 0x27f   : > { %v1348_v54 = vadd.f32 %v1746_v1, %v1010_v46  ;;  %v1749_v45 = vadd.f32 %v1748_v49, %v1747_v48 }
 0x281   : > { %v1351_v18 = vadd.f32 %v1749_v45, %v1015_v57  ;;  %v1432_v47 = vmax.f32 %v1348_v54, 0.0 }
 0x283   : > { %v1433_v23 = vmax.f32 %v1351_v18, 0.0  ;;  %v1750_v62 = vpop.f32.mrb[32].mxu1 }
 0x284   : > { %v1751_v2 = vpop.f32.mrb[33].mxu1 }
 0x285   : > { %v2502_v30 = vpack.c.bf16 %v1433_v23, %v1432_v47  ;;  %v1752_v51 = vadd.f32 %v1751_v2, %v1750_v62  ;;  %v1753_v63 = vpop.f32.mrb[34].mxu1 }
 0x286   : > { %v1754_v3 = vpop.f32.mrb[35].mxu1 }
 0x287   : > { %v1356_v5 = vadd.f32 %v1752_v51, %v2441_v26  ;;  %v1755_v7 = vadd.f32 %v1754_v3, %v1753_v63 }
 0x289   : > { %v1359_v8 = vadd.f32 %v1755_v7, %v2443_v28  ;;  %v1434_v9 = vmax.f32 %v1356_v5, 0.0 }
 0x28b   : > { %v1435_v10 = vmax.f32 %v1359_v8, 0.0  ;;  %v1756_v12 = vpop.f32.mrb[36].mxu1 }
 0x28c   : > { %v1757_v14 = vpop.f32.mrb[37].mxu1 }
 0x28d   : > { %v1758_v15 = vadd.f32 %v1757_v14, %v1756_v12  ;;  %v1759_v17 = vpop.f32.mrb[38].mxu1  ;;  %v1459_v20 = vpack.c.bf16 %v1435_v10, %v1434_v9 }
 0x28e   : > { %v1760_v21 = vpop.f32.mrb[39].mxu1 }
 0x28f   : > { %v1364_v32 = vadd.f32 %v1758_v15, %v2445_v40  ;;  %v1761_v24 = vadd.f32 %v1760_v21, %v1759_v17  ;;  %1798 = vmatprep.subr.bf16.mxu0 %v1459_v20 }
 0x290   : > { %1799 = vmatpush3.bf16.msra.mxu0 %v2472_v42 }
 0x291   : > { %v1367_v27 = vadd.f32 %v1761_v24, %v2447_v35  ;;  %v1436_v26 = vmax.f32 %v1364_v32, 0.0 }
 0x293   : > { %v1437_v33 = vmax.f32 %v1367_v27, 0.0  ;;  %v1762_v29 = vpop.f32.mrb[40].mxu1 }
 0x294   : > { %v1763_v28 = vpop.f32.mrb[41].mxu1 }
 0x295   : > { %v1764_v34 = vadd.f32 %v1763_v28, %v1762_v29  ;;  %v1765_v38 = vpop.f32.mrb[42].mxu1  ;;  %v1460_v4 = vpack.c.bf16 %v1437_v33, %v1436_v26 }
 0x296   : > { %v1766_v43 = vpop.f32.mrb[43].mxu1 }
 0x297   : > { %v1372_v52 = vadd.f32 %v1764_v34, %v2449_v41  ;;  %v1767_v1 = vadd.f32 %v1766_v43, %v1765_v38  ;;  %1800 = vmatprep.subr.bf16.mxu0 %v1460_v4 }
 0x298   : > { %1801 = vmatpush3.bf16.msra.mxu0 %v2476_v13 }
 0x299   : > { %v1375_v40 = vadd.f32 %v1767_v1, %v2451_v39  ;;  %v1438_v48 = vmax.f32 %v1372_v52, 0.0 }
 0x29b   : > { %v1439_v42 = vmax.f32 %v1375_v40, 0.0  ;;  %v1768_v46 = vpop.f32.mrb[44].mxu1 }
 0x29c   : > { %v1769_v35 = vpop.f32.mrb[45].mxu1 }
 0x29d   : > { %v1770_v49 = vadd.f32 %v1769_v35, %v1768_v46  ;;  %v1771_v54 = vpop.f32.mrb[46].mxu1  ;;  %v1461_v45 = vpack.c.bf16 %v1439_v42, %v1438_v48 }
 0x29e   : > { %v1772_v57 = vpop.f32.mrb[47].mxu1 }
 0x29f   : > { %v1380_v18 = vadd.f32 %v1770_v49, %v2465_v58  ;;  %v1773_v47 = vadd.f32 %v1772_v57, %v1771_v54  ;;  %1802 = vmatprep.subr.bf16.mxu0 %v1461_v45 }
 0x2a0   : > { %1803 = vmatpush3.bf16.msra.mxu0 %v2480_v31 }
 0x2a1   : > { %v1383_v41 = vadd.f32 %v1773_v47, %v2470_v60  ;;  %v1440_v23 = vmax.f32 %v1380_v18, 0.0 }
 0x2a3   : > { %v1441_v13 = vmax.f32 %v1383_v41, 0.0  ;;  %v1774_v62 = vpop.f32.mrb[48].mxu1 }
 0x2a4   : > { %v1775_v39 = vpop.f32.mrb[49].mxu1 }
 0x2a5   : > { %v1776_v2 = vadd.f32 %v1775_v39, %v1774_v62  ;;  %v1777_v51 = vpop.f32.mrb[50].mxu1  ;;  %v1462_v63 = vpack.c.bf16 %v1441_v13, %v1440_v23 }
 0x2a6   : > { %v1778_v3 = vpop.f32.mrb[51].mxu1 }
 0x2a7   : > { %v1388_v5 = vadd.f32 %v1776_v2, %v2474_v11  ;;  %v1779_v7 = vadd.f32 %v1778_v3, %v1777_v51  ;;  %1804 = vmatprep.subr.bf16.mxu0 %v1462_v63 }
 0x2a8   : > { %1805 = vmatpush3.bf16.msra.mxu0 %v2486_v44 }
 0x2a9   : > { %v1391_v58 = vadd.f32 %v1779_v7, %v2478_v16  ;;  %v1442_v8 = vmax.f32 %v1388_v5, 0.0 }
 0x2ab   : > { %v1443_v31 = vmax.f32 %v1391_v58, 0.0  ;;  %v1780_v9 = vpop.f32.mrb[52].mxu1 }
 0x2ac   : > { %v1781_v60 = vpop.f32.mrb[53].mxu1 }
 0x2ad   : > { %v1782_v10 = vadd.f32 %v1781_v60, %v1780_v9  ;;  %v1783_v12 = vpop.f32.mrb[54].mxu1  ;;  %v1463_v14 = vpack.c.bf16 %v1443_v31, %v1442_v8 }
 0x2ae   : > { %v1784_v15 = vpop.f32.mrb[55].mxu1 }
 0x2af   : > { %v1396_v17 = vadd.f32 %v1782_v10, %v2482_v50  ;;  %v1785_v20 = vadd.f32 %v1784_v15, %v1783_v12  ;;  %1806 = vmatprep.subr.bf16.mxu0 %v1463_v14 }
 0x2b0   : > { %1807 = vmatpush3.bf16.msra.mxu0 %v2490_v0 }
 0x2b1   : > { %v1399_v11 = vadd.f32 %v1785_v20, %v2484_v55  ;;  %v1444_v21 = vmax.f32 %v1396_v17, 0.0 }
 0x2b3   : > { %v1445_v44 = vmax.f32 %v1399_v11, 0.0  ;;  %v1786_v32 = vpop.f32.mrb[56].mxu1 }
 0x2b4   : > { %v1787_v16 = vpop.f32.mrb[57].mxu1 }
 0x2b5   : > { %v1788_v24 = vadd.f32 %v1787_v16, %v1786_v32  ;;  %v1789_v27 = vpop.f32.mrb[58].mxu1  ;;  %v1464_v26 = vpack.c.bf16 %v1445_v44, %v1444_v21 }
 0x2b6   : > { %v1790_v33 = vpop.f32.mrb[59].mxu1 }
 0x2b7   : > { %v1404_v29 = vadd.f32 %v1788_v24, %v2488_v61  ;;  %v1791_v28 = vadd.f32 %v1790_v33, %v1789_v27  ;;  %1808 = vmatprep.subr.bf16.mxu0 %v1464_v26 }
 0x2b8   : > { %1809 = vmatpush3.bf16.msra.mxu0 %v2494_v22 }
 0x2b9   : > { %v1407_v50 = vadd.f32 %v1791_v28, %v2492_v6  ;;  %v1446_v34 = vmax.f32 %v1404_v29, 0.0  ;;  %v1475_v6 = vsub.s32 0, %v2453_v53 }
 0x2bb   : > { %v1447_v0 = vmax.f32 %v1407_v50, 0.0  ;;  %v1792_v38 = vpop.f32.mrb[60].mxu1 }
 0x2bc   : > { %v1793_v55 = vpop.f32.mrb[61].mxu1 }
 0x2bd   : > { %v1794_v4 = vadd.f32 %v1793_v55, %v1792_v38  ;;  %v1795_v43 = vpop.f32.mrb[62].mxu1  ;;  %v1465_v52 = vpack.c.bf16 %v1447_v0, %v1446_v34 }
 0x2be   : > { %v1796_v1 = vpop.f32.mrb[63].mxu1 }
 0x2bf   : > { %v1412_v40 = vadd.f32 %v1794_v4, %v2496_v25  ;;  %v1797_v48 = vadd.f32 %v1796_v1, %v1795_v43  ;;  %1810 = vmatprep.subr.bf16.mxu0 %v1465_v52  ;;  %v1471_v25 = vpop.permute.xlu0 %1470 }
 0x2c0   : > { %1811 = vmatpush3.bf16.msra.mxu0 %v2500_v37  ;;  %v1476_v37 = vrot.slane %v1471_v25, %v1475_v6 }
 0x2c1   : > { %v1415_v61 = vadd.f32 %v1797_v48, %v2498_v36  ;;  %v1448_v42 = vmax.f32 %v1412_v40, 0.0 }
 0x2c3   : > { %v1449_v22 = vmax.f32 %v1415_v61, 0.0 }
 0x2c5   : > { %v1466_v46 = vpack.c.bf16 %v1449_v22, %v1448_v42 }
 0x2c7   : > { %1812 = vmatprep.subr.bf16.mxu0 %v1466_v46 }
 0x2c8   : > { %1813 = vmatpush3.bf16.msra.mxu0 %v2502_v30 }
 0x2cb   : > { %1535 = vmatmul.mubr.bf16.vlgmr.msra.gmra.mrb[32].mxu0 %v1492_v59 }
 0x39e   : > { %v1814_v35 = vpop.f32.mrb[32].mxu0 }
 0x39f   : > { %v1815_v49 = vpop.f32.mrb[33].mxu0 }
 0x3a0   : > { %v1816_v54 = vadd.f32 %v1815_v49, %v1814_v35  ;;  %v1817_v36 = vpop.f32.mrb[34].mxu0 }
 0x3a1   : > { %v1818_v45 = vpop.f32.mrb[35].mxu0 }
 0x3a2   : > { %v1537_v57 = vadd.f32 %v1816_v54, %v1476_v37 }
 0x3a4   : > { %v1542_v18 = vsub.f32 0.0, %v1537_v57 }
 0x3a6   : > { %v1543_v47 = vmul.f32 1.442695, %v1542_v18 }
 0x3a8   : > { %1952 = vpow2.f32 %v1543_v47 }
 0x3b2   : > { %v1953_v30 = vpop.eup %1952 }
 0x3b3   : > { %v1545_v41 = vadd.f32 1.0, %v1953_v30 }
 0x3b5   : > { %1954 = vrcp.f32 %v1545_v41 }
 0x3bf   : > { %v1955_v53 = vpop.eup %1954 }
 0x3c0   : > { %1548 = vst [vmem:[%s278_s19] sm:$0x1] %v1955_v53 }
 0x3c1 PF: > { %s19_s26 = sadd.s32 1, %s1962_s26  }
 0x3c2   : > { %p16_p5 = scmp.ge.s32.totalorder %s19_s26, 4  }
 0x3c4   :  { %18 = sbr.rel (!%p16_p5) target bundleno = 3 (0x3), region = 78 }

</bundles_post_ra>
